<compile_context>
chip_gen: v5e
topology: v5e:2x2
jax: 0.10.0
libtpu: 0.0.40
codegen_flags: <defaults>
</compile_context>

<pallas_src>
import functools

import jax
import jax.numpy as jnp
from jax.experimental import pallas as pl
from jax.experimental.pallas import tpu as pltpu


def _contrast_loss_kernel(anchor_ref, reasm_ref, label_ref, out_ref, acc_ref,
                          *, batch, block_b, tiles_per_core):
    c = pl.program_id(0)          # parallel (per-core) axis
    j = pl.program_id(1)          # sequential reduction axis

    @pl.when(j == 0)
    def _init():
        acc_ref[...] = jnp.zeros_like(acc_ref)

    a = anchor_ref[...].astype(jnp.float32)            # (TB, D)
    r = reasm_ref[...].astype(jnp.float32)             # (TB, D)
    lbl = label_ref[...].astype(jnp.float32)           # (TB, 1)

    dot = jnp.sum(a * r, axis=-1, keepdims=True)       # (TB, 1)  XLU reduce
    na2 = jnp.sum(a * a, axis=-1, keepdims=True)
    nr2 = jnp.sum(r * r, axis=-1, keepdims=True)

    # ATen cosine_similarity: dot / sqrt(clamp_min(|a|^2 * |r|^2, eps^2)), eps=1e-8.
    eps2 = jnp.float32(1e-16)
    cos = dot * jax.lax.rsqrt(jnp.maximum(na2 * nr2, eps2))   # rsqrt -> EUP slot

    # Mask the ragged last tile (and any fully-masked "extra" tile from the
    # parallel split) by *logical* row id; where() keeps garbage/NaN out.
    tile = c * tiles_per_core + j
    row = tile * block_b + jax.lax.broadcasted_iota(jnp.int32, (block_b, 1), 0)
    summand = jnp.where(row < batch, -cos * lbl, 0.0)   # (TB, 1)

    acc_ref[...] += summand                              # VALU carry across j

    @pl.when(j == tiles_per_core - 1)
    def _finalize():
        part = jnp.sum(acc_ref[...])                     # single reduce per core
        ii = jax.lax.broadcasted_iota(jnp.int32, (8, 128), 0)
        jj = jax.lax.broadcasted_iota(jnp.int32, (8, 128), 1)
        # Per-core partial lives at [0, 0] of this core's output block; the
        # rest of the block is zero so the wrapper can simply sum everything.
        out_ref[...] = jnp.where((ii == 0) & (jj == 0), part, 0.0)


def contrast_loss(anchor_fea, reassembly_fea, contrast_label, *,
                  block_b=None, num_parallel=2):
    """anchor_fea, reassembly_fea: (B, D); contrast_label: (B,). Returns scalar f32."""
    B, D = anchor_fea.shape
    itemsize = max(jnp.dtype(anchor_fea.dtype).itemsize,
                   jnp.dtype(reassembly_fea.dtype).itemsize)

    # Safe on every generation: v5e/v6e have 128 MiB physical, v7x 64 MiB
    # physical with a 32 MiB scoped default.
    vmem_limit_bytes = 32 * 1024 * 1024

    if block_b is None:
        # Per-row VMEM cost:
        #   2 feature inputs x 2 pipeline buffers x D x itemsize   (BlockSpec DMA bufs)
        # + ~3 f32 in-kernel intermediates x D x 4                 (a, r upcasts + product)
        # + label double buffer + (TB,1) accumulator, lane-padded  (~3 x 512 B)
        per_row = 4 * D * itemsize + 12 * D + 1536
        budget = 20 * 1024 * 1024                # headroom under the 32 MiB limit
        cap = max(8, budget // per_row)
        # Target ~4 MiB of feature DMA per grid step (amortizes ~0.35us/step overhead).
        rows_target = max(64, (4 * 1024 * 1024) // max(1, 2 * D * itemsize))
        block_b = min(cap, rows_target)
    # Round to sublane multiple and never tile wider than the (rounded) batch.
    block_b = max(8, (int(block_b) // 8) * 8)
    block_b = min(block_b, max(8, ((B + 7) // 8) * 8))

    num_tiles = pl.cdiv(B, block_b)
    num_par = max(1, min(int(num_parallel), num_tiles))   # 2 uses both v7x cores
    tiles_per_core = pl.cdiv(num_tiles, num_par)

    label_2d = contrast_label.reshape(B, 1).astype(jnp.float32)

    def feat_map(c, j):
        # Clamp so we never request a block fully outside the array; the row-id
        # mask in the kernel zeroes any such duplicated/ragged contribution.
        return (jnp.minimum(c * tiles_per_core + j, num_tiles - 1), 0)

    out = pl.pallas_call(
        functools.partial(_contrast_loss_kernel, batch=B, block_b=block_b,
                          tiles_per_core=tiles_per_core),
        out_shape=jax.ShapeDtypeStruct((num_par * 8, 128), jnp.float32),
        grid_spec=pltpu.PrefetchScalarGridSpec(
            num_scalar_prefetch=0,
            grid=(num_par, tiles_per_core),
            in_specs=[
                pl.BlockSpec((block_b, D), feat_map),
                pl.BlockSpec((block_b, D), feat_map),
                pl.BlockSpec((block_b, 1), feat_map),
            ],
            out_specs=pl.BlockSpec((8, 128), lambda c, j: (c, 0)),
            scratch_shapes=[pltpu.VMEM((block_b, 1), jnp.float32)],
        ),
        compiler_params=pltpu.CompilerParams(
            dimension_semantics=("parallel", "arbitrary"),
            vmem_limit_bytes=vmem_limit_bytes,
        ),
        cost_estimate=pl.CostEstimate(
            flops=6 * B * D,
            transcendentals=B,
            bytes_accessed=2 * B * D * itemsize + 4 * B + num_par * 8 * 128 * 4,
        ),
    )(anchor_fea, reassembly_fea, label_2d)

    # Sum the per-core partials (only [8c, 0] entries are nonzero) and take mean.
    return jnp.sum(out) * jnp.float32(1.0 / B)


def contrast_loss_ref(anchor_fea, reassembly_fea, contrast_label):
    """Pure-JAX reference mirroring the PyTorch module (ATen eps^2 clamp)."""
    a = anchor_fea.astype(jnp.float32)
    r = reassembly_fea.astype(jnp.float32)
    lbl = contrast_label.astype(jnp.float32)
    dot = jnp.sum(a * r, axis=-1)
    na2 = jnp.sum(a * a, axis=-1)
    nr2 = jnp.sum(r * r, axis=-1)
    cos = dot / jnp.sqrt(jnp.maximum(na2 * nr2, 1e-16))
    return jnp.mean(-cos * lbl)


if __name__ == "__main__":
    key = jax.random.PRNGKey(0)
    k1, k2, k3, k4, k5, k6 = jax.random.split(key, 6)

    # Case 1: explicit block_b -> 2 tiles over 2 "cores", ragged last tile
    # (rows 24..31 masked in-kernel, no wrapper-side padding).
    B, D = 24, 256
    anchor = jax.random.normal(k1, (B, D), dtype=jnp.float32)
    reassembly = jax.random.normal(k2, (B, D), dtype=jnp.float32)
    label = jax.random.bernoulli(k3, p=0.5, shape=(B,)).astype(jnp.float32)

    out = jax.block_until_ready(contrast_loss(anchor, reassembly, label, block_b=16))
    ref = contrast_loss_ref(anchor, reassembly, label)
    assert jnp.allclose(out, ref, atol=1e-5, rtol=1e-5), (out, ref)

    # Case 2: auto-sized block_b, B not a multiple of 8, single tile.
    B2, D2 = 100, 160
    anchor2 = jax.random.normal(k4, (B2, D2), dtype=jnp.float32)
    reassembly2 = jax.random.normal(k5, (B2, D2), dtype=jnp.float32)
    label2 = jax.random.bernoulli(k6, p=0.5, shape=(B2,)).astype(jnp.float32)

    out2 = jax.block_until_ready(contrast_loss(anchor2, reassembly2, label2))
    ref2 = contrast_loss_ref(anchor2, reassembly2, label2)
    assert jnp.allclose(out2, ref2, atol=1e-5, rtol=1e-5), (out2, ref2)

    print("KERNEL_OK")
</pallas_src>

<mosaic_0001>
module attributes {stable_mosaic.version = 11 : i64} {
  func.func @_contrast_loss_kernel(%arg0: i32, %arg1: i32, %arg2: memref<16x256xf32, #tpu.memory_space<vmem>>, %arg3: memref<16x256xf32, #tpu.memory_space<vmem>>, %arg4: memref<16x1xf32, #tpu.memory_space<vmem>>, %arg5: memref<8x128xf32, #tpu.memory_space<vmem>>, %arg6: memref<16x1xf32, #tpu.memory_space<vmem>>) attributes {dimension_semantics = [#tpu.dimension_semantics<parallel>, #tpu.dimension_semantics<arbitrary>], iteration_bounds = array<i64: 2, 1>, scalar_prefetch = 0 : i64, scratch_operands = 1 : i64, tpu.core_type = #tpu.core_type<tc>, window_params = [{transform_indices = @transform_0, window_bounds = array<i64: 16, 256>}, {transform_indices = @transform_1, window_bounds = array<i64: 16, 256>}, {transform_indices = @transform_2, window_bounds = array<i64: 16, 1>}, {transform_indices = @transform_3, window_bounds = array<i64: 8, 128>}]} {
    %c0_i32 = arith.constant 0 : i32
    %0 = arith.cmpi eq, %arg1, %c0_i32 : i32
    %1 = arith.extui %0 : i1 to i32
    %c0_i32_0 = arith.constant 0 : i32
    %2 = arith.cmpi ne, %1, %c0_i32_0 : i32
    scf.if %2 {
      %cst_17 = arith.constant 0.000000e+00 : f32
      %39 = vector.broadcast %cst_17 : f32 to vector<16x1xf32>
      %c0_18 = arith.constant 0 : index
      %c0_19 = arith.constant 0 : index
      %40 = vector.load %arg6[%c0_18, %c0_19] : memref<16x1xf32, #tpu.memory_space<vmem>>, vector<16x1xf32>
      tpu.vector_store %arg6[%c0_18, %c0_19], %39 {strides = array<i32>} : memref<16x1xf32, #tpu.memory_space<vmem>>, vector<16x1xf32>,
    } else {
    }
    %c0 = arith.constant 0 : index
    %c0_1 = arith.constant 0 : index
    %3 = vector.load %arg2[%c0, %c0_1] : memref<16x256xf32, #tpu.memory_space<vmem>>, vector<16x256xf32>
    %c0_2 = arith.constant 0 : index
    %c0_3 = arith.constant 0 : index
    %4 = vector.load %arg3[%c0_2, %c0_3] : memref<16x256xf32, #tpu.memory_space<vmem>>, vector<16x256xf32>
    %c0_4 = arith.constant 0 : index
    %c0_5 = arith.constant 0 : index
    %5 = vector.load %arg4[%c0_4, %c0_5] : memref<16x1xf32, #tpu.memory_space<vmem>>, vector<16x1xf32>
    %6 = arith.mulf %3, %4 : vector<16x256xf32>
    %cst = arith.constant dense<0.000000e+00> : vector<16xf32>
    %7 = vector.multi_reduction <add>, %6, %cst [1] : vector<16x256xf32> to vector<16xf32>
    %8 = vector.shape_cast %7 : vector<16xf32> to vector<16x1xf32>
    %9 = arith.mulf %3, %3 : vector<16x256xf32>
    %cst_6 = arith.constant dense<0.000000e+00> : vector<16xf32>
    %10 = vector.multi_reduction <add>, %9, %cst_6 [1] : vector<16x256xf32> to vector<16xf32>
    %11 = vector.shape_cast %10 : vector<16xf32> to vector<16x1xf32>
    %12 = arith.mulf %4, %4 : vector<16x256xf32>
    %cst_7 = arith.constant dense<0.000000e+00> : vector<16xf32>
    %13 = vector.multi_reduction <add>, %12, %cst_7 [1] : vector<16x256xf32> to vector<16xf32>
    %14 = vector.shape_cast %13 : vector<16xf32> to vector<16x1xf32>
    %15 = arith.mulf %11, %14 : vector<16x1xf32>
    %cst_8 = arith.constant 1.000000e-16 : f32
    %16 = vector.broadcast %cst_8 : f32 to vector<16x1xf32>
    %17 = arith.maximumf %15, %16 : vector<16x1xf32>
    %18 = math.rsqrt %17 : vector<16x1xf32>
    %19 = arith.mulf %8, %18 : vector<16x1xf32>
    %c1_i32 = arith.constant 1 : i32
    %20 = arith.muli %arg0, %c1_i32 : i32
    %21 = arith.addi %20, %arg1 : i32
    %c16_i32 = arith.constant 16 : i32
    %22 = arith.muli %21, %c16_i32 : i32
    %23 = tpu.iota {dimensions = array<i32: 0>} : vector<16x1xi32>
    %24 = vector.broadcast %22 : i32 to vector<16x1xi32>
    %25 = arith.addi %24, %23 : vector<16x1xi32>
    %c24_i32 = arith.constant 24 : i32
    %26 = vector.broadcast %c24_i32 : i32 to vector<16x1xi32>
    %27 = arith.cmpi slt, %25, %26 : vector<16x1xi32>
    %cst_9 = arith.constant 0.000000e+00 : f32
    %28 = vector.broadcast %cst_9 : f32 to vector<16x1xf32>
    %29 = arith.subf %28, %19 : vector<16x1xf32>
    %30 = arith.mulf %29, %5 : vector<16x1xf32>
    %cst_10 = arith.constant 0.000000e+00 : f32
    %31 = vector.broadcast %cst_10 : f32 to vector<16x1xf32>
    %32 = arith.select %27, %30, %31 : vector<16x1xi1>, vector<16x1xf32>
    %c0_11 = arith.constant 0 : index
    %c0_12 = arith.constant 0 : index
    %33 = vector.load %arg6[%c0_11, %c0_12] : memref<16x1xf32, #tpu.memory_space<vmem>>, vector<16x1xf32>
    %34 = arith.addf %33, %32 : vector<16x1xf32>
    %c0_13 = arith.constant 0 : index
    %c0_14 = arith.constant 0 : index
    %35 = vector.load %arg6[%c0_13, %c0_14] : memref<16x1xf32, #tpu.memory_space<vmem>>, vector<16x1xf32>
    tpu.vector_store %arg6[%c0_13, %c0_14], %34 {strides = array<i32>} : memref<16x1xf32, #tpu.memory_space<vmem>>, vector<16x1xf32>,
    %c0_i32_15 = arith.constant 0 : i32
    %36 = arith.cmpi eq, %arg1, %c0_i32_15 : i32
    %37 = arith.extui %36 : i1 to i32
    %c0_i32_16 = arith.constant 0 : i32
    %38 = arith.cmpi ne, %37, %c0_i32_16 : i32
    scf.if %38 {
      %c0_17 = arith.constant 0 : index
      %c0_18 = arith.constant 0 : index
      %39 = vector.load %arg6[%c0_17, %c0_18] : memref<16x1xf32, #tpu.memory_space<vmem>>, vector<16x1xf32>
      %40 = vector.shape_cast %39 : vector<16x1xf32> to vector<1x16x1xf32>
      %cst_19 = arith.constant dense<0.000000e+00> : vector<1xf32>
      %41 = vector.multi_reduction <add>, %40, %cst_19 [1, 2] : vector<1x16x1xf32> to vector<1xf32>
      %42 = vector.shape_cast %41 : vector<1xf32> to vector<1x1x1xf32>
      %43 = vector.extract %42[0, 0, 0] : f32 from vector<1x1x1xf32>
      %44 = tpu.iota {dimensions = array<i32: 0>} : vector<8x128xi32>
      %45 = tpu.iota {dimensions = array<i32: 1>} : vector<8x128xi32>
      %c0_i32_20 = arith.constant 0 : i32
      %46 = vector.broadcast %c0_i32_20 : i32 to vector<8x128xi32>
      %47 = arith.cmpi eq, %44, %46 : vector<8x128xi32>
      %c0_i32_21 = arith.constant 0 : i32
      %48 = vector.broadcast %c0_i32_21 : i32 to vector<8x128xi32>
      %49 = arith.cmpi eq, %45, %48 : vector<8x128xi32>
      %50 = arith.andi %47, %49 : vector<8x128xi1>
      %cst_22 = arith.constant 0.000000e+00 : f32
      %51 = vector.broadcast %43 : f32 to vector<8x128xf32>
      %52 = vector.broadcast %cst_22 : f32 to vector<8x128xf32>
      %53 = arith.select %50, %51, %52 : vector<8x128xi1>, vector<8x128xf32>
      %c0_23 = arith.constant 0 : index
      %c0_24 = arith.constant 0 : index
      %54 = vector.load %arg5[%c0_23, %c0_24] : memref<8x128xf32, #tpu.memory_space<vmem>>, vector<8x128xf32>
      tpu.vector_store %arg5[%c0_23, %c0_24], %53 {strides = array<i32>} : memref<8x128xf32, #tpu.memory_space<vmem>>, vector<8x128xf32>,
    } else {
    }
    return
  }
  func.func @transform_0(%arg0: i32, %arg1: i32) -> (i32, i32) {
    %c1_i32 = arith.constant 1 : i32
    %0 = arith.muli %arg0, %c1_i32 : i32
    %1 = arith.addi %0, %arg1 : i32
    %c1_i32_0 = arith.constant 1 : i32
    %2 = arith.minsi %1, %c1_i32_0 : i32
    %c0_i32 = arith.constant 0 : i32
    %c0_i32_1 = arith.constant 0 : i32
    return %2, %c0_i32 : i32, i32
  }
  func.func @transform_1(%arg0: i32, %arg1: i32) -> (i32, i32) {
    %c1_i32 = arith.constant 1 : i32
    %0 = arith.muli %arg0, %c1_i32 : i32
    %1 = arith.addi %0, %arg1 : i32
    %c1_i32_0 = arith.constant 1 : i32
    %2 = arith.minsi %1, %c1_i32_0 : i32
    %c0_i32 = arith.constant 0 : i32
    %c0_i32_1 = arith.constant 0 : i32
    return %2, %c0_i32 : i32, i32
  }
  func.func @transform_2(%arg0: i32, %arg1: i32) -> (i32, i32) {
    %c1_i32 = arith.constant 1 : i32
    %0 = arith.muli %arg0, %c1_i32 : i32
    %1 = arith.addi %0, %arg1 : i32
    %c1_i32_0 = arith.constant 1 : i32
    %2 = arith.minsi %1, %c1_i32_0 : i32
    %c0_i32 = arith.constant 0 : i32
    %c0_i32_1 = arith.constant 0 : i32
    return %2, %c0_i32 : i32, i32
  }
  func.func @transform_3(%arg0: i32, %arg1: i32) -> (i32, i32) {
    %c0_i32 = arith.constant 0 : i32
    %c0_i32_0 = arith.constant 0 : i32
    return %arg0, %c0_i32 : i32, i32
  }
}

</mosaic_0001>

<bundles_post_ra>
// kernel: tpu_custom_call.1
= control target key start
LH: loop header
LB: loop body
LE: loop exit
PB: predicated region body
PF: predicated region fallthrough
CT: control target
= control target key end

     0   :  { %s1215_s0 = inlined_call_operand.hbm [shape: f32[24,256], index: 0, kind: input, shape index: {}]   ;;  %s1216_s1 = inlined_call_operand.hbm [shape: f32[24,256], index: 1, kind: input, shape index: {}]   ;;  %s1217_s2 = inlined_call_operand.vmem [shape: f32[24,1], index: 2, kind: input, shape index: {}]   ;;  %s1218_s3 = inlined_call_operand.hbm [shape: f32[16,128], index: 3, kind: output, shape index: {}]  }
   0x1   :  { %1222 = sst [smem:[#allocation15_spill]] %s1215_s0 }
   0x2   :  { %8 = vsyncpa [#allocation4], 0 }
   0x3   :  { %10 = vsyncpa [#allocation4 + $0x1], 0 }
   0x4   :  { %11 = vsyncpa [#allocation7], 0 }
   0x5   :  { %13 = vsyncpa [#allocation7 + $0x1], 0 }
   0x6   :  { %14 = vsyncpa [#allocation5], 0 }
   0x7   :  { %16 = vsyncpa [#allocation5 + $0x1], 0  ;;  %s960_s12 = smov 0   ;;  %s962_s13 = smov 0  }
   0x8   :  { %s964_s14 = smov 0   ;;  %s966_s15 = smov 0  }
   0x9   :  { %s968_s16 = smov 0   ;;  %s970_s17 = smov 0  }
   0xa   :  { %s972_s18 = smov 0   ;;  %s974_s19 = smov 0  }
   0xb   :  { %s976_s20 = smov 0  }
   0xc LB: > { %1223 = sst [smem:[#allocation12_spill]] %s927_s19  ;;  %s612_s21 = sadd.s32 4294967295, %s931_s20   ;;  %s931_s20 = sphi %s976_s20, %s22_s20   ;;  %s927_s19 = sphi %s974_s19, %s1236_s19   ;;  %s923_s18 = sphi %s972_s18, %s1235_s18   ;;  %s919_s17 = sphi %s970_s17, %s1242_s17   ;;  %s915_s16 = sphi %s968_s16, %s1241_s16   ;;  %s911_s15 = sphi %s966_s15, %s1240_s15   ;;  %s907_s14 = sphi %s964_s14, %s1239_s14   ;;  %s903_s13 = sphi %s962_s13, %s1238_s13   ;;  %s899_s12 = sphi %s960_s12, %s1237_s12  }
   0xd   : > { %s613_s22 = sadd.s32 4294967294, %s931_s20   ;;  %s34_s23 = sadd.s32 1, %s927_s19 }
   0xe   : > { %p39_p0 = scmp.lt.s32.totalorder %s927_s19, 1  ;;  %p36_p1 = scmp.ge.s32.totalorder %s34_s23, 2 }
   0xf   : > { %s47_s24 = sadd.s32 1, %s919_s17  ;;  %p54_p2 = scmp.ne.s32.totalorder %s919_s17, %s915_s16 }
  0x10   : > { %s1009_s25 = scalar_select %p39_p0, %s927_s19, 1 }
  0x11   : > { %s1244_s23 = smov (%p36_p1, %s34_s23), 0  ;;  %p55_p3 = scmp.eq.s32.totalorder %s931_s20, 0 }
  0x12   : > { %1224 = sst [smem:[#allocation13_spill]] %s1244_s23  ;;  %p42_p4 = scmp.lt.s32.totalorder %s1244_s23, 1 }
  0x13   : > { %p60_p5 = scmp.ne.s32.totalorder %s915_s16, %s911_s15  ;;  %p1018_p6 = por %p55_p3, %p54_p2 }
  0x14   : > { %p61_p7 = scmp.eq.s32.totalorder %s612_s21, 0  ;;  %s134_s29 = ssub.s32 %s927_s19, %s1244_s23 }
  0x15   : > { %s43_s27 = scalar_select %p42_p4, %s1244_s23, 1 }
  0x16   : > { %p1023_p8 = por %p61_p7, %p60_p5  ;;  %p135_p9 = scmp.eq.s32.totalorder %s134_s29, 0 }
  0x17   : > { %s44_s30 = ssub.s32 %s1009_s25, %s43_s27  ;;  %s137_s4 = sadd.s32 1, %s907_s14 }
  0x18   : > { %p45_p10 = scmp.eq.s32.totalorder %s44_s30, 0  ;;  %p147_p11 = scmp.ne.s32.totalorder %s907_s14, %s903_s13 }
  0x19   : > { %s1032_s5 = scalar_select %p135_p9, %s907_s14, %s137_s4  }
  0x1a   : > { %s1035_s6 = scalar_select %p45_p10, %s919_s17, %s47_s24  }
  0x1b   : > { %p148_p12 = scmp.eq.s32.totalorder %s612_s21, 1  ;;  %p153_p13 = scmp.ne.s32.totalorder %s903_s13, %s899_s12 }
  0x1c   : > { %1227 = sst [smem:[#allocation14_spill]] %s1035_s6  ;;  %p154_p0 = scmp.eq.s32.totalorder %s613_s22, 1 }
  0x1d   : > { %p1041_p1 = por %p148_p12, %p147_p11  ;;  %p615_p3 = scmp.ge.s32.totalorder %s931_s20, 2 }
  0x1e   : > { %p1045_p2 = por %p154_p0, %p153_p13 }
  0x1f   : > { %170 = sbr.rel (%p615_p3) target bundleno = 115 (0x73), region = 16 }
  0x24   : > { %173 = sbr.rel (!%p1018_p6) target bundleno = 79 (0x4f), region = 20  ;;  %s174_s9 = sand.u32 (%p1018_p6), 1, %s919_s17  }
  0x25   : > { %s617_s10 = sshll.u32 (%p1018_p6), %s1009_s25, 1  ;;  %s616_s11 = sshll.u32 (%p1018_p6), %s174_s9, 5 }
  0x26   : > { %s183_s15 = ssub.s32 (%p1018_p6), 3, %s617_s10  ;;  %s1059_s27 = scalar_lea.sflag (%p1018_p6), [#allocation4], %s174_s9 }
  0x27   : > { %p184_p4 = scmp.lt.s32.totalorder (%p1018_p6), %s183_s15, 2  ;;  %s178_s29 = scalar_lea.vmem (%p1018_p6), [#allocation3], %s616_s11 }
  0x29   : > { %s1246_s15 = smov (!%p184_p4, %s183_s15), 2 }
  0x2a   : > { %s645_s21 = sshll.u32 %s1246_s15, 4 }
  0x2b   : > { %s188_s22 = ssub.s32 32, %s645_s21 }
  0x2c   : > { %s189_s24 = sshll.u32 %s188_s22, 4 }
  0x2d   : > { %190 = vsyncadd %s1059_s27, %s189_s24  ;;  %p1062_p5 = scmp.ne.s32.totalorder %s645_s21, 0  ;;  %s647_s4 = sshll.u32 %s1009_s25, 5 }
  0x2e   : > { %s1231_s0 = sld [smem:[#allocation15_spill]]  ;;  %s1070_s6 = sshll.u32 %s178_s29, 4  ;;  %s199_s6 = int_to_ptr.vmem [resolvable:$true] %s1070_s6 }
  0x2f   : > { %s1221_s11 = sshll.u32 %s1246_s15, 8 }
  0x30   : > { %s745_s21 = sshrl.u32 %s1221_s11, 4 }
  0x34   : > { %s194_s19 = scalar_lea.hbm %s1231_s0, %s647_s4  ;;  %s754_s29 = scalar_lea.hbm %s1231_s0, 48 }
  0x35   : > { %s196_s9 = sshll.u32 %s194_s19, 4  ;;  %s1073_s9 = int_to_ptr.hbm [resolvable:$true] %s196_s9 }
  0x36   : > { %s743_s22 = sshra.s32 %s1073_s9, 4  ;;  %s744_s22 = int_to_ptr.hbm [resolvable:$true] %s743_s22 }
  0x37   : > { %s750_s24 = scalar_lea.hbm %s744_s22, %s745_s21 }
  0x38   : > { %p751_p7 = scmp.ne.s32.totalorder %s744_s22, %s750_s24  ;;  %p756_p11 = scmp.lt.s32.totalorder %s754_s29, %s750_s24 }
  0x3a   : > { %p752_p9 = pnand %p751_p7, %p1062_p5 }
  0x3c   : > { %p753_p10 = pneg %p752_p9 }
  0x3e   : > { %p758_p12 = pnand %p756_p11, %p753_p10 }
  0x40   : > { %761 = shalt.err (!%p758_p12)
}
  0x41   : > { %s762_s19 = sshra.s32 %s199_s6, 4  ;;  %s933_s22 = smov [#allocation3]   ;;  %s763_s19 = int_to_ptr.vmem [resolvable:$true] %s762_s19 }
  0x42   : > { %s769_s10 = scalar_lea.vmem %s763_s19, %s745_s21  ;;  %s773_s11 = scalar_lea.vmem %s933_s22, 64 }
  0x43   : > { %p770_p13 = scmp.ne.s32.totalorder %s763_s19, %s769_s10  ;;  %p775_p7 = scmp.lt.s32.totalorder %s773_s11, %s769_s10 }
  0x45   : > { %p771_p0 = pnand %p770_p13, %p1062_p5 }
  0x47   : > { %p772_p4 = pneg %p771_p0 }
  0x49   : > { %p777_p9 = pnand %p775_p7, %p772_p4 }
  0x4b   : > { %780 = shalt.err (!%p777_p9)
}
  0x4c   : > { %s934_s23 = smov 256   ;;  %s935_s24 = smov 16  }
  0x4d   : > { %s1232_s4 = sshll.u32 %s1246_s15, 8 }
  0x4e   : > { %204 = dma.hbm_to_vmem [thread:$0]  (%p1062_p5), %s1073_s9, %s1232_s4, %s199_s6, %s1059_s27, %s934_s23, %s934_s23, %s935_s24  }
  0x4f PF: > { %207 = sbr.rel (!%p1018_p6) target bundleno = 115 (0x73), region = 24  ;;  %s208_s11 = sand.u32 (%p1018_p6), 1, %s919_s17  }
  0x50   : > { %s626_s21 = sshll.u32 (%p1018_p6), %s1009_s25, 1  ;;  %s625_s29 = sshll.u32 (%p1018_p6), %s208_s11, 5 }
  0x51   : > { %s217_s19 = ssub.s32 (%p1018_p6), 3, %s626_s21  ;;  %s1103_s0 = scalar_lea.sflag (%p1018_p6), [#allocation7], %s208_s11 }
  0x52   : > { %p218_p10 = scmp.lt.s32.totalorder (%p1018_p6), %s217_s19, 2  ;;  %s212_s6 = scalar_lea.vmem (%p1018_p6), [#allocation6], %s625_s29 }
  0x54   : > { %s1248_s19 = smov (!%p218_p10, %s217_s19), 2 }
  0x55   : > { %s648_s10 = sshll.u32 %s1248_s19, 4 }
  0x56   : > { %s222_s22 = ssub.s32 32, %s648_s10 }
  0x57   : > { %s223_s30 = sshll.u32 %s222_s22, 4 }
  0x58   : > { %224 = vsyncadd %s1103_s0, %s223_s30  ;;  %p1106_p6 = scmp.ne.s32.totalorder %s648_s10, 0  ;;  %s650_s15 = sshll.u32 %s1009_s25, 5 }
  0x59   : > { %s228_s23 = scalar_lea.hbm %s1216_s1, %s650_s15  ;;  %s1114_s24 = sshll.u32 %s212_s6, 4  ;;  %s233_s24 = int_to_ptr.vmem [resolvable:$true] %s1114_s24 }
  0x5a   : > { %s230_s4 = sshll.u32 %s228_s23, 4  ;;  %s633_s11 = sshll.u32 %s1248_s19, 8  ;;  %s1117_s4 = int_to_ptr.hbm [resolvable:$true] %s230_s4 }
  0x5b   : > { %s782_s21 = sshra.s32 %s1117_s4, 4  ;;  %s784_s29 = sshrl.u32 %s633_s11, 4  ;;  %s783_s21 = int_to_ptr.hbm [resolvable:$true] %s782_s21 }
  0x5c   : > { %s789_s10 = scalar_lea.hbm %s783_s21, %s784_s29  ;;  %s793_s30 = scalar_lea.hbm %s1216_s1, 48 }
  0x5d   : > { %p790_p5 = scmp.ne.s32.totalorder %s783_s21, %s789_s10  ;;  %p795_p13 = scmp.lt.s32.totalorder %s793_s30, %s789_s10 }
  0x5f   : > { %p791_p11 = pnand %p790_p5, %p1106_p6 }
  0x61   : > { %p792_p12 = pneg %p791_p11 }
  0x63   : > { %p797_p0 = pnand %p795_p13, %p792_p12 }
  0x65   : > { %800 = shalt.err (!%p797_p0)
}
  0x66   : > { %s801_s6 = sshra.s32 %s233_s24, 4  ;;  %s936_s27 = smov [#allocation6]   ;;  %s802_s6 = int_to_ptr.vmem [resolvable:$true] %s801_s6 }
  0x67   : > { %s808_s15 = scalar_lea.vmem %s802_s6, %s784_s29  ;;  %s812_s9 = scalar_lea.vmem %s936_s27, 64 }
  0x68   : > { %p809_p4 = scmp.ne.s32.totalorder %s802_s6, %s808_s15  ;;  %p814_p10 = scmp.lt.s32.totalorder %s812_s9, %s808_s15 }
  0x6a   : > { %p810_p7 = pnand %p809_p4, %p1106_p6 }
  0x6c   : > { %p811_p9 = pneg %p810_p7 }
  0x6e   : > { %p816_p5 = pnand %p814_p10, %p811_p9 }
  0x70   : > { %819 = shalt.err (!%p816_p5)
}
  0x71   : > { %s937_s23 = smov 256   ;;  %s938_s21 = smov 16  }
  0x72   : > { %238 = dma.hbm_to_vmem [thread:$0]  (%p1106_p6), %s1117_s4, %s633_s11, %s233_s24, %s1103_s0, %s937_s23, %s937_s23, %s938_s21  }
  0x73 PF: > { %p634_p11 = scmp.ge.s32.totalorder %s931_s20, 1  ;;  %p263_p12 = scmp.lt.s32.totalorder %s931_s20, 3 }
  0x75   : > { %p264_p13 = pnand %p634_p11, %p263_p12 }
  0x76   : > { %s269_s29 = sand.u32 (!%p264_p13), 1, %s915_s16  }
  0x77   : > { %267 = sbr.rel (%p264_p13) target bundleno = 482 (0x1e2), region = 32  ;;  %s635_s10 = sshll.u32 (!%p264_p13), %s269_s29, 5 }
  0x78   : > { %s270_s25 = scalar_lea.sflag (!%p264_p13), [#allocation4], %s269_s29  ;;  %s273_s22 = scalar_lea.vmem (!%p264_p13), [#allocation3], %s635_s10 }
  0x7c   : > { %886 = dma.done.wait (%p1023_p8), %s270_s25, 512  }
  0x7d   : > { %888 = vsyncadd (%p1023_p8), %s270_s25, 4294966784  ;;  %s280_s0 = scalar_lea.sflag [#allocation7], %s269_s29  ;;  %s283_s19 = scalar_lea.vmem [#allocation6], %s635_s10 }
  0x7e   : > { %890 = dma.done.wait (%p1023_p8), %s280_s0, 512  }
  0x7f   : > { %892 = vsyncadd (%p1023_p8), %s280_s0, 4294966784  ;;  %v373_v0 = vld [vmem:[%s283_s19] sm:$0xff]  ;;  %v374_v1 = vld [vmem:[%s283_s19 + $0x8] sm:$0xff]  ;;  %vm366_vm0 = vcmask 7168   ;;  %v939_v26 = vmov 0.0   ;;  %p343_p8 = scmp.lt.s32.totalorder %s923_s18, 1  ;;  %v437_v38 = vlaneseq }
  0x80   : > { %v369_v2 = vld [vmem:[%s273_s22] sm:$0xff]  ;;  %v399_v3 = vmul.f32 %v373_v0, %v373_v0  ;;  %v400_v4 = vmul.f32 %v374_v1, %v374_v1  ;;  %v370_v5 = vld [vmem:[%s273_s22 + $0x8] sm:$0xff]  ;;  %v375_v9 = vld [vmem:[%s283_s19 + $0x10] sm:$0xff]  ;;  %367 = vst.msk [vmem:[#allocation2] sm:$0xff] %vm366_vm0, %v939_v26  ;;  %s640_s24 = sshll.u32 %s923_s18, 4  ;;  %s321_s15 = sand.u32 1, %s903_s13  }
  0x81   : > { %v389_v6 = vmul.f32 %v369_v2, %v369_v2  ;;  %v379_v7 = vmul.f32 %v373_v0, %v369_v2  ;;  %v390_v8 = vmul.f32 %v370_v5, %v370_v5  ;;  %v376_v10 = vld [vmem:[%s283_s19 + $0x18] sm:$0xff]  ;;  %v371_v11 = vld [vmem:[%s273_s22 + $0x10] sm:$0xff]  ;;  %v380_v12 = vmul.f32 %v374_v1, %v370_v5  ;;  %368 = vst.msk [vmem:[#allocation2 + $0x8] sm:$0xff] %vm366_vm0, %v939_v26  ;;  %s344_s28 = scalar_select %p343_p8, %s923_s18, 1 }
  0x82   : > { %v403_v13 = vadd.f32 %v400_v4, %v399_v3  ;;  %v372_v14 = vld [vmem:[%s273_s22 + $0x18] sm:$0xff]  ;;  %v401_v17 = vmul.f32 %v375_v9, %v375_v9  ;;  %v402_v18 = vmul.f32 %v376_v10, %v376_v10  ;;  %v391_v19 = vmul.f32 %v371_v11, %v371_v11  ;;  %s637_s27 = sshll.u32 %s321_s15, 3  ;;  %s642_s9 = sshll.u32 %s923_s18, 3 }
  0x83   : > { %v393_v15 = vadd.f32 %v390_v8, %v389_v6  ;;  %v383_v16 = vadd.f32 %v380_v12, %v379_v7  ;;  %v392_v20 = vmul.f32 %v372_v14, %v372_v14  ;;  %v381_v21 = vmul.f32 %v375_v9, %v371_v11  ;;  %s638_s26 = sshll.u32 %s344_s28, 1  ;;  %s494_s29 = scalar_lea.hbm %s1218_s3, %s642_s9 }
  0x84   : > { %404 = vadd.xlane.f32.xlu1 %v403_v13  ;;  %v382_v22 = vmul.f32 %v376_v10, %v372_v14  ;;  %v406_v23 = vadd.f32 %v402_v18, %v401_v17  ;;  %p350_p6 = scmp.lt.s32.totalorder %s638_s26, 2  ;;  %v1156_v41 = vshrl.u32 %v437_v38, 7  ;;  %v440_v44 = vstv %s640_s24  ;;  %s323_s10 = scalar_lea.vmem [#allocation8], %s637_s27 }
  0x85   : > { %394 = vadd.xlane.f32.xlu0 %v393_v15  ;;  %384 = vadd.xlane.f32.xlu2 %v383_v16  ;;  %v396_v24 = vadd.f32 %v392_v20, %v391_v19  ;;  %v476_v19 = vand.u32 127, %v437_v38  ;;  %s496_s25 = sshll.u32 %s323_s10, 4  ;;  %s498_s22 = sshll.u32 %s494_s29, 4  ;;  %s497_s25 = int_to_ptr.vmem [resolvable:$true] %s496_s25  ;;  %s499_s22 = int_to_ptr.hbm [resolvable:$true] %s498_s22 }
  0x86   : > { %v386_v25 = vadd.f32 %v382_v22, %v381_v21  ;;  %s1250_s26 = smov (!%p350_p6, %s638_s26), 2  ;;  %v441_v49 = vadd.s32 %v440_v44, %v1156_v41  ;;  %v439_v55 = vadd.s32 8, %v1156_v41  ;;  %vm477_vm9 = vcmp.eq.s32.totalorder %v1156_v41, 0  ;;  %s484_s19 = scalar_lea.sflag [#allocation5], %s321_s15 }
  0x87   : > { %s639_s4 = sshll.u32 %s1250_s26, 3  ;;  %v451_v57 = vld [vmem:[#allocation2] sm:$0xff]  ;;  %vm478_vm10 = vcmp.eq.s32.totalorder %v476_v19, 0  ;;  %s835_s18 = sshra.s32 %s499_s22, 4  ;;  %s836_s18 = int_to_ptr.hbm [resolvable:$true] %s835_s18 }
  0x88   : > { %s353_s6 = scalar_lea.vmem %s1217_s2, %s639_s4  ;;  %vm443_vm4 = vcmp.lt.s32.totalorder %v441_v49, 24  ;;  %v442_v63 = vadd.s32 %v440_v44, %v439_v55  ;;  %v452_v4 = vld [vmem:[#allocation2 + $0x8] sm:$0xff]  ;;  %vm479_vm11 = vmand %vm477_vm9, %vm478_vm10  ;;  %s837_s28 = scalar_lea.hbm %s836_s18, 8 }
  0x89   : > { %v377_v52 = vld [vmem:[%s353_s6] sm:$0xff]  ;;  %v378_v1 = vld [vmem:[%s353_s6 + $0x8] sm:$0xff]  ;;  %p838_p0 = scmp.ne.s32.totalorder %s836_s18, %s837_s28  ;;  %s841_s4 = scalar_lea.hbm %s1218_s3, 16 }
  0x8a   : > { %vm444_vm8 = vcmp.lt.s32.totalorder %v442_v63, 24  ;;  %p842_p9 = scmp.lt.s32.totalorder %s836_s18, %s1218_s3  ;;  %p843_p10 = scmp.lt.s32.totalorder %s841_s4, %s837_s28 }
  0x8b   : > { %p839_p4 = pnand %p838_p0, %p1041_p1 }
  0x8c   : > { %407 = vadd.xlane.f32.xlu1 %v406_v23  ;;  %p844_p5 = por %p843_p10, %p842_p9 }
  0x8d   : > { %397 = vadd.xlane.f32.xlu0 %v396_v24  ;;  %387 = vadd.xlane.f32.xlu2 %v386_v25  ;;  %p840_p7 = pneg %p839_p4 }
  0x8f   : > { %p845_p11 = pnand %p844_p5, %p840_p7 }
  0xf7   : > { %v405_v27 = vpop.xlane.xlu1 %404 }
  0xf8   : > { %v395_v28 = vpop.xlane.xlu0 %394  ;;  %v385_v42 = vpop.xlane.xlu2 %384 }
  0xf9   : > { %v409_v29 = vmul.f32 %v405_v27, %v395_v28 }
  0xfb   : > { %v411_v30 = vmax.f32 %v409_v29, 1e-16 }
  0xfd   : > { %739 = vrsqrt.f32 %v411_v30  ;;  %vm419_vm2 = vweird.f32 %v411_v30 }
  0xff   : > { %v408_v31 = vpop.xlane.xlu1 %407 }
 0x100   : > { %v398_v32 = vpop.xlane.xlu0 %397  ;;  %v388_v59 = vpop.xlane.xlu2 %387 }
 0x101   : > { %v410_v33 = vmul.f32 %v408_v31, %v398_v32 }
 0x103   : > { %v740_v34 = vpop.eup %739  ;;  %v412_v35 = vmax.f32 %v410_v33, 1e-16 }
 0x104   : > { %v414_v36 = vmul.f32 %v740_v34, %v411_v30  ;;  %vm420_vm1 = vweird.f32 %v740_v34 }
 0x105   : > { %741 = vrsqrt.f32 %v412_v35  ;;  %vm421_vm3 = vmor %vm419_vm2, %vm420_vm1  ;;  %vm429_vm6 = vweird.f32 %v412_v35 }
 0x106   : > { %v415_v37 = vmul.f32 %v740_v34, %v414_v36 }
 0x108   : > { %v416_v39 = vmul.f32 0.5, %v415_v37 }
 0x10a   : > { %v417_v40 = vsub.f32 1.5, %v416_v39 }
 0x10b   : > { %v742_v43 = vpop.eup %741 }
 0x10c   : > { %v424_v45 = vmul.f32 %v742_v43, %v412_v35  ;;  %v418_v46 = vmul.f32 %v740_v34, %v417_v40  ;;  %vm430_vm5 = vweird.f32 %v742_v43 }
 0x10d   : > { %vm431_vm7 = vmor %vm429_vm6, %vm430_vm5 }
 0x10e   : > { %v425_v47 = vmul.f32 %v742_v43, %v424_v45  ;;  %v422_v48 = vsel %vm421_vm3, %v740_v34, %v418_v46 }
 0x10f   : > { %v433_v50 = vmul.f32 %v422_v48, %v385_v42 }
 0x110   : > { %v426_v51 = vmul.f32 0.5, %v425_v47 }
 0x111   : > { %v445_v53 = vsub.f32 0.0, %v433_v50 }
 0x112   : > { %v427_v54 = vsub.f32 1.5, %v426_v51 }
 0x113   : > { %v447_v56 = vmul.f32 %v445_v53, %v377_v52 }
 0x114   : > { %v428_v58 = vmul.f32 %v742_v43, %v427_v54 }
 0x115   : > { %v449_v60 = vsel %vm443_vm4, %v447_v56, 0.0 }
 0x116   : > { %v453_v61 = vadd.f32 %v451_v57, %v449_v60  ;;  %v432_v62 = vsel %vm431_vm7, %v742_v43, %v428_v58 }
 0x117   : > { %v434_v0 = vmul.f32 %v432_v62, %v388_v59 }
 0x118   : > { %456 = vst.msk [vmem:[#allocation2] sm:$0xff] %vm366_vm0, %v453_v61 }
 0x119   : > { %v446_v2 = vsub.f32 0.0, %v434_v0 }
 0x11b   : > { %v448_v3 = vmul.f32 %v446_v2, %v378_v1 }
 0x11d   : > { %v450_v5 = vsel %vm444_vm8, %v448_v3, 0.0 }
 0x11e   : > { %v454_v6 = vadd.f32 %v452_v4, %v450_v5 }
 0x11f   : > { %v461_v7 = vld [vmem:[#allocation2] sm:$0xff] }
 0x120   : > { %457 = vst.msk [vmem:[#allocation2 + $0x8] sm:$0xff] %vm366_vm0, %v454_v6  ;;  %v463_v9 = vsel %vm366_vm0, %v461_v7, 0.0 }
 0x127   : > { %v462_v8 = vld [vmem:[#allocation2 + $0x8] sm:$0xff] }
 0x128   : > { %v464_v10 = vsel %vm366_vm0, %v462_v8, 0.0 }
 0x129   : > { %v465_v11 = vadd.f32 %v464_v10, %v463_v9 }
 0x12b   : > { %466 = vadd.xlane.f32.xlu0 %v465_v11 }
 0x19e   : > { %v467_v12 = vpop.xlane.xlu0 %466 }
 0x19f   : > { %v468_v13 = vrot.slane %v467_v12, 4 }
 0x1a1   : > { %v469_v14 = vadd.f32 %v468_v13, %v467_v12 }
 0x1a3   : > { %v470_v15 = vrot.slane %v469_v14, 2 }
 0x1a5   : > { %v471_v16 = vadd.f32 %v470_v15, %v469_v14 }
 0x1a7   : > { %v472_v17 = vrot.slane %v471_v16, 1 }
 0x1a9   : > { %v473_v18 = vadd.f32 %v472_v17, %v471_v16 }
 0x1ab   : > { %651 = vpush %v473_v18 }
 0x1dc   : > { %s652_s0 = spop %651 }
 0x1dd   : > { %v480_v20 = vstv %s652_s0 }
 0x1de   : > { %v481_v21 = vsel %vm479_vm11, %v480_v20, 0.0 }
 0x1df   : > { %482 = vst [vmem:[%s323_s10] sm:$0xff] %v481_v21 }
 0x1e0   : > { %848 = shalt.err (!%p845_p11)
}
 0x1e1   : > { %655 = dma.vmem_to_hbm [thread:$0]  (%p1041_p1), %s497_s25, 128, %s499_s22, %s484_s19  }
 0x1e2 PF: > { %s510_s6 = sand.u32 1, %s899_s12   ;;  %p658_p12 = pnand %p615_p3, %p1045_p2 }
 0x1e3   : > { %s511_s15 = scalar_lea.sflag [#allocation5], %s510_s6 }
 0x1e4   : > { %p659_p13 = pneg %p658_p12 }
 0x1e6   : > { %894 = dma.done.wait (%p659_p13), %s511_s15, 128  }
 0x1e7   : > { %896 = vsyncadd (%p659_p13), %s511_s15, 4294967168  ;;  %s22_s20 = sadd.s32 1, %s931_s20   ;;  %s1234_s7 = sld [smem:[#allocation14_spill]] }
 0x1e8   : > { %p19_p8 = scmp.ge.s32.totalorder %s22_s20, 4   ;;  %s1235_s18 = sld [smem:[#allocation12_spill]] }
 0x1e9   : > { %s1236_s19 = sld [smem:[#allocation13_spill]]  ;;  %s1237_s12 = smov %s903_s13 }
 0x1ea   : > { %s1238_s13 = smov %s907_s14  ;;  %s1239_s14 = smov %s1032_s5 }
 0x1eb   : > { %s1240_s15 = smov %s915_s16  ;;  %s1241_s16 = smov %s919_s17 }
 0x1ec   :  { %21 = sbr.rel (!%p19_p8) target bundleno = 12 (0xc), region = 101 }
 0x1ed   : > { %s1242_s17 = smov %s1234_s7 }
 0x1f1   :  { %517 = vsyncpa [#allocation4], 1 }
 0x1f2   :  { %519 = vsyncpa [#allocation4 + $0x1], 1 }
 0x1f3   :  { %520 = vsyncpa [#allocation7], 1 }
 0x1f4   :  { %522 = vsyncpa [#allocation7 + $0x1], 1 }
 0x1f5   :  { %523 = vsyncpa [#allocation5], 1 }
 0x1f6   :  { %525 = vsyncpa [#allocation5 + $0x1], 1 }

</bundles_post_ra>
